<compile_context>
chip_gen: v6e
topology: v6e:2x2x1
jax: 0.10.0
libtpu: 0.0.40
codegen_flags: <defaults>
</compile_context>

<pallas_src>
import functools

import jax
import jax.numpy as jnp
from jax.experimental import pallas as pl
from jax.experimental.pallas import tpu as pltpu


def _mlp_softmax_kernel(xp_ref, w1_ref, b1_ref, w2_ref, b2_ref, w3_ref, b3_ref,
                        ones_ref, op_ref):
    """Packed forward pass for one batch tile, lane-dense end-to-end."""
    x = xp_ref[...].astype(jnp.bfloat16)            # (tile_rows, pack*P) bf16

    def sigmoid(z):
        # logistic(z) == 0.5*(1 + tanh(z/2)); tanh issues on the EUP slot
        # instead of an f32 divide on the VALU path.
        return 0.5 * (jnp.tanh(0.5 * z) + 1.0)

    # Linear 1 + Sigmoid  (block-diagonal weights keep the packed layout)
    z1 = jnp.dot(x, w1_ref[...], preferred_element_type=jnp.float32)
    h1 = sigmoid(z1 + b1_ref[...])                  # (tile_rows, pack*H) f32

    # Linear 2 + Sigmoid
    z2 = jnp.dot(h1.astype(jnp.bfloat16), w2_ref[...],
                 preferred_element_type=jnp.float32)
    h2 = sigmoid(z2 + b2_ref[...])

    # Linear 3
    z3 = jnp.dot(h2.astype(jnp.bfloat16), w3_ref[...],
                 preferred_element_type=jnp.float32)
    z3 = z3 + b3_ref[...]                           # (tile_rows, pack*P) f32

    # Softmax over each P-lane group (PyTorch dim=1).  Subtracting the *row*
    # max is exact (softmax is shift-invariant within every group) and keeps
    # the reduction a lane-dense XLU op; only pathological logit spreads
    # (>~80 between samples packed in the same row) could underflow a group.
    z3 = z3 - jnp.max(z3, axis=-1, keepdims=True)
    e = jnp.exp(z3).astype(jnp.bfloat16)            # bf16 numerator
    # Per-group sums, broadcast back to every lane of the group, via a
    # block-diagonal ones matmul on the MXU (f32 accumulate of the SAME bf16
    # values used in the numerator -> rows sum to 1 to f32 precision).
    denom = jnp.dot(e, ones_ref[...], preferred_element_type=jnp.float32)
    op_ref[...] = e.astype(jnp.float32) / denom     # exact f32 normalization


def _block_diag(w, pack):
    """(in, out) -> (pack*in, pack*out) with `pack` copies of w on the diag."""
    if pack == 1:
        return w
    kin, kout = w.shape
    eye = jnp.eye(pack, dtype=w.dtype)
    return jnp.einsum("pq,io->piqo", eye, w).reshape(pack * kin, pack * kout)


def prepare_params(w1, b1, w2, b2, w3, b3):
    """One-time weight prep: block-diagonalize, cast to bf16, tile biases.

    w*: (in, out) float32 (transpose of PyTorch nn.Linear.weight), b*: (1, out).
    Done once at model init so the per-call forward launches a single kernel.
    """
    num_products = w1.shape[0]
    pack = 128 // num_products if (num_products <= 128 and
                                   128 % num_products == 0) else 1
    return dict(
        w1=_block_diag(w1, pack).astype(jnp.bfloat16),
        b1=jnp.tile(b1, (1, pack)).astype(jnp.float32),
        w2=_block_diag(w2, pack).astype(jnp.bfloat16),
        b2=jnp.tile(b2, (1, pack)).astype(jnp.float32),
        w3=_block_diag(w3, pack).astype(jnp.bfloat16),
        b3=jnp.tile(b3, (1, pack)).astype(jnp.float32),
        ones=_block_diag(jnp.ones((num_products, num_products), jnp.float32),
                         pack).astype(jnp.bfloat16),
    )


@functools.partial(jax.jit, static_argnames=("grid_steps",))
def neural_net_forward(x, params, *, grid_steps=1):
    """x: (B, P) float32.  params: prepare_params(...) output.  Returns (B, P).

    grid_steps=1 for single-TensorCore chips (v5e/v6e); use 2 (or 2k) on v7x
    so both TensorCores get a "parallel" grid step.
    """
    B, P = x.shape
    w1, b1 = params["w1"], params["b1"]
    w2, b2 = params["w2"], params["b2"]
    w3, b3 = params["w3"], params["b3"]
    ones = params["ones"]
    packP = ones.shape[0]          # pack * P  (128 when packing applies)
    pack = packP // P
    packH = b1.shape[1]            # pack * H

    assert B % pack == 0, "batch must be a multiple of the lane-pack factor"
    packed_rows = B // pack
    assert packed_rows % grid_steps == 0, "grid_steps must divide packed rows"
    tile_rows = packed_rows // grid_steps
    # f32 input/output blocks: sublane dim must be a multiple of 8 unless the
    # block covers the whole (packed) batch.
    assert tile_rows % 8 == 0 or tile_rows == packed_rows, (
        "packed tile rows must be a multiple of 8 (or cover the full batch)")

    # Free, row-major-contiguous reshape; stays f32 (cast to bf16 in-kernel).
    xp = x.reshape(packed_rows, packP)

    out_packed = pl.pallas_call(
        _mlp_softmax_kernel,
        out_shape=jax.ShapeDtypeStruct((packed_rows, packP), jnp.float32),
        grid_spec=pl.GridSpec(
            grid=(grid_steps,),
            in_specs=[
                pl.BlockSpec((tile_rows, packP), lambda i: (i, 0)),  # x tile
                pl.BlockSpec((packP, packH), lambda i: (0, 0)),      # W1 (resident)
                pl.BlockSpec((1, packH), lambda i: (0, 0)),          # b1
                pl.BlockSpec((packH, packH), lambda i: (0, 0)),      # W2
                pl.BlockSpec((1, packH), lambda i: (0, 0)),          # b2
                pl.BlockSpec((packH, packP), lambda i: (0, 0)),      # W3
                pl.BlockSpec((1, packP), lambda i: (0, 0)),          # b3
                pl.BlockSpec((packP, packP), lambda i: (0, 0)),      # ones (block-diag)
            ],
            out_specs=pl.BlockSpec((tile_rows, packP), lambda i: (i, 0)),
        ),
        compiler_params=pltpu.CompilerParams(
            dimension_semantics=("parallel",)),
    )(xp, w1, b1, w2, b2, w3, b3, ones)
    return out_packed.reshape(B, P)


def reference_forward(x, w1, b1, w2, b2, w3, b3):
    h1 = jax.nn.sigmoid(x @ w1 + b1)
    h2 = jax.nn.sigmoid(h1 @ w2 + b2)
    return jax.nn.softmax(h2 @ w3 + b3, axis=1)


if __name__ == "__main__":
    # Synthetic recogym-like config: num_products = 16, num_hidden = 32.
    num_products = 16
    num_hidden = 32
    batch = 256

    key = jax.random.PRNGKey(0)
    kx, k1, k2, k3, k4, k5, k6 = jax.random.split(key, 7)

    x = jax.random.normal(kx, (batch, num_products), dtype=jnp.float32)

    # Weights stored as (in, out); equivalent to the transpose of PyTorch's
    # nn.Linear weight of shape (out, in).
    scale = 0.1
    w1 = scale * jax.random.normal(k1, (num_products, num_hidden), jnp.float32)
    b1 = scale * jax.random.normal(k2, (1, num_hidden), jnp.float32)
    w2 = scale * jax.random.normal(k3, (num_hidden, num_hidden), jnp.float32)
    b2 = scale * jax.random.normal(k4, (1, num_hidden), jnp.float32)
    w3 = scale * jax.random.normal(k5, (num_hidden, num_products), jnp.float32)
    b3 = scale * jax.random.normal(k6, (1, num_products), jnp.float32)

    # One-time weight prep (block-diagonalize + bf16 cast), then one forward.
    params = prepare_params(w1, b1, w2, b2, w3, b3)
    out = neural_net_forward(x, params, grid_steps=1)   # grid_steps=2 on v7x
    out = jax.block_until_ready(out)

    ref = reference_forward(x, w1, b1, w2, b2, w3, b3)
    assert out.shape == (batch, num_products)
    # bf16 MXU operands -> slightly looser tolerance vs the f32 reference.
    assert jnp.allclose(out, ref, atol=5e-3, rtol=5e-3), "mismatch vs reference"
    # Exact f32 normalization -> softmax rows sum to 1 to ~f32 precision.
    assert jnp.allclose(jnp.sum(out, axis=1), 1.0, atol=1e-4)

    print("KERNEL_OK")
</pallas_src>

<mosaic_0001>
module attributes {stable_mosaic.version = 11 : i64} {
  func.func @_mlp_softmax_kernel(%arg0: i32, %arg1: memref<32x128xf32, #tpu.memory_space<vmem>>, %arg2: memref<128x256xbf16, #tpu.memory_space<vmem>>, %arg3: memref<1x256xf32, #tpu.memory_space<vmem>>, %arg4: memref<256x256xbf16, #tpu.memory_space<vmem>>, %arg5: memref<1x256xf32, #tpu.memory_space<vmem>>, %arg6: memref<256x128xbf16, #tpu.memory_space<vmem>>, %arg7: memref<1x128xf32, #tpu.memory_space<vmem>>, %arg8: memref<128x128xbf16, #tpu.memory_space<vmem>>, %arg9: memref<32x128xf32, #tpu.memory_space<vmem>>) attributes {dimension_semantics = [#tpu.dimension_semantics<parallel>], iteration_bounds = array<i64: 1>, scalar_prefetch = 0 : i64, scratch_operands = 0 : i64, tpu.core_type = #tpu.core_type<tc>, window_params = [{transform_indices = @transform_0, window_bounds = array<i64: 32, 128>}, {pipeline_mode = #tpu.pipeline_mode<synchronous>, transform_indices = @transform_1, window_bounds = array<i64: 128, 256>}, {pipeline_mode = #tpu.pipeline_mode<synchronous>, transform_indices = @transform_2, window_bounds = array<i64: 1, 256>}, {pipeline_mode = #tpu.pipeline_mode<synchronous>, transform_indices = @transform_3, window_bounds = array<i64: 256, 256>}, {pipeline_mode = #tpu.pipeline_mode<synchronous>, transform_indices = @transform_4, window_bounds = array<i64: 1, 256>}, {pipeline_mode = #tpu.pipeline_mode<synchronous>, transform_indices = @transform_5, window_bounds = array<i64: 256, 128>}, {pipeline_mode = #tpu.pipeline_mode<synchronous>, transform_indices = @transform_6, window_bounds = array<i64: 1, 128>}, {pipeline_mode = #tpu.pipeline_mode<synchronous>, transform_indices = @transform_7, window_bounds = array<i64: 128, 128>}, {transform_indices = @transform_8, window_bounds = array<i64: 32, 128>}]} {
    %c0 = arith.constant 0 : index
    %c0_0 = arith.constant 0 : index
    %0 = vector.load %arg1[%c0, %c0_0] : memref<32x128xf32, #tpu.memory_space<vmem>>, vector<32x128xf32>
    %1 = arith.truncf %0 : vector<32x128xf32> to vector<32x128xbf16>
    %c0_1 = arith.constant 0 : index
    %c0_2 = arith.constant 0 : index
    %2 = vector.load %arg2[%c0_1, %c0_2] : memref<128x256xbf16, #tpu.memory_space<vmem>>, vector<128x256xbf16>
    %cst = arith.constant dense<0.000000e+00> : vector<32x256xf32>
    %3 = tpu.matmul %1, %2, %cst {dimension_numbers = #tpu.dot_dimension_numbers<[1], [0], [0], [1], [0, 0, 1, 1], [], []>} : vector<32x128xbf16>, vector<128x256xbf16>, vector<32x256xf32> -> vector<32x256xf32>
    %c0_3 = arith.constant 0 : index
    %c0_4 = arith.constant 0 : index
    %4 = vector.load %arg3[%c0_3, %c0_4] : memref<1x256xf32, #tpu.memory_space<vmem>>, vector<1x256xf32>
    %5 = vector.broadcast %4 : vector<1x256xf32> to vector<32x256xf32>
    %6 = arith.addf %3, %5 : vector<32x256xf32>
    %cst_5 = arith.constant 5.000000e-01 : f32
    %7 = vector.broadcast %cst_5 : f32 to vector<32x256xf32>
    %8 = arith.mulf %7, %6 : vector<32x256xf32>
    %9 = math.tanh %8 : vector<32x256xf32>
    %cst_6 = arith.constant 1.000000e+00 : f32
    %10 = vector.broadcast %cst_6 : f32 to vector<32x256xf32>
    %11 = arith.addf %9, %10 : vector<32x256xf32>
    %cst_7 = arith.constant 5.000000e-01 : f32
    %12 = vector.broadcast %cst_7 : f32 to vector<32x256xf32>
    %13 = arith.mulf %12, %11 : vector<32x256xf32>
    %14 = arith.truncf %13 : vector<32x256xf32> to vector<32x256xbf16>
    %c0_8 = arith.constant 0 : index
    %c0_9 = arith.constant 0 : index
    %15 = vector.load %arg4[%c0_8, %c0_9] : memref<256x256xbf16, #tpu.memory_space<vmem>>, vector<256x256xbf16>
    %cst_10 = arith.constant dense<0.000000e+00> : vector<32x256xf32>
    %16 = tpu.matmul %14, %15, %cst_10 {dimension_numbers = #tpu.dot_dimension_numbers<[1], [0], [0], [1], [0, 0, 1, 1], [], []>} : vector<32x256xbf16>, vector<256x256xbf16>, vector<32x256xf32> -> vector<32x256xf32>
    %c0_11 = arith.constant 0 : index
    %c0_12 = arith.constant 0 : index
    %17 = vector.load %arg5[%c0_11, %c0_12] : memref<1x256xf32, #tpu.memory_space<vmem>>, vector<1x256xf32>
    %18 = vector.broadcast %17 : vector<1x256xf32> to vector<32x256xf32>
    %19 = arith.addf %16, %18 : vector<32x256xf32>
    %cst_13 = arith.constant 5.000000e-01 : f32
    %20 = vector.broadcast %cst_13 : f32 to vector<32x256xf32>
    %21 = arith.mulf %20, %19 : vector<32x256xf32>
    %22 = math.tanh %21 : vector<32x256xf32>
    %cst_14 = arith.constant 1.000000e+00 : f32
    %23 = vector.broadcast %cst_14 : f32 to vector<32x256xf32>
    %24 = arith.addf %22, %23 : vector<32x256xf32>
    %cst_15 = arith.constant 5.000000e-01 : f32
    %25 = vector.broadcast %cst_15 : f32 to vector<32x256xf32>
    %26 = arith.mulf %25, %24 : vector<32x256xf32>
    %27 = arith.truncf %26 : vector<32x256xf32> to vector<32x256xbf16>
    %c0_16 = arith.constant 0 : index
    %c0_17 = arith.constant 0 : index
    %28 = vector.load %arg6[%c0_16, %c0_17] : memref<256x128xbf16, #tpu.memory_space<vmem>>, vector<256x128xbf16>
    %cst_18 = arith.constant dense<0.000000e+00> : vector<32x128xf32>
    %29 = tpu.matmul %27, %28, %cst_18 {dimension_numbers = #tpu.dot_dimension_numbers<[1], [0], [0], [1], [0, 0, 1, 1], [], []>} : vector<32x256xbf16>, vector<256x128xbf16>, vector<32x128xf32> -> vector<32x128xf32>
    %c0_19 = arith.constant 0 : index
    %c0_20 = arith.constant 0 : index
    %30 = vector.load %arg7[%c0_19, %c0_20] : memref<1x128xf32, #tpu.memory_space<vmem>>, vector<1x128xf32>
    %31 = vector.broadcast %30 : vector<1x128xf32> to vector<32x128xf32>
    %32 = arith.addf %29, %31 : vector<32x128xf32>
    %cst_21 = arith.constant dense<0xFF800000> : vector<32xf32>
    %33 = vector.multi_reduction <maximumf>, %32, %cst_21 [1] : vector<32x128xf32> to vector<32xf32>
    %34 = vector.shape_cast %33 : vector<32xf32> to vector<32x1xf32>
    %35 = vector.broadcast %34 : vector<32x1xf32> to vector<32x128xf32>
    %36 = arith.subf %32, %35 : vector<32x128xf32>
    %37 = math.exp %36 : vector<32x128xf32>
    %38 = arith.truncf %37 : vector<32x128xf32> to vector<32x128xbf16>
    %c0_22 = arith.constant 0 : index
    %c0_23 = arith.constant 0 : index
    %39 = vector.load %arg8[%c0_22, %c0_23] : memref<128x128xbf16, #tpu.memory_space<vmem>>, vector<128x128xbf16>
    %cst_24 = arith.constant dense<0.000000e+00> : vector<32x128xf32>
    %40 = tpu.matmul %38, %39, %cst_24 {dimension_numbers = #tpu.dot_dimension_numbers<[1], [0], [0], [1], [0, 0, 1, 1], [], []>} : vector<32x128xbf16>, vector<128x128xbf16>, vector<32x128xf32> -> vector<32x128xf32>
    %41 = arith.extf %38 : vector<32x128xbf16> to vector<32x128xf32>
    %42 = arith.divf %41, %40 : vector<32x128xf32>
    %c0_25 = arith.constant 0 : index
    %c0_26 = arith.constant 0 : index
    %43 = vector.load %arg9[%c0_25, %c0_26] : memref<32x128xf32, #tpu.memory_space<vmem>>, vector<32x128xf32>
    tpu.vector_store %arg9[%c0_25, %c0_26], %42 {strides = array<i32>} : memref<32x128xf32, #tpu.memory_space<vmem>>, vector<32x128xf32>,
    return
  }
  func.func @transform_0(%arg0: i32) -> (i32, i32) {
    %c0_i32 = arith.constant 0 : i32
    %c0_i32_0 = arith.constant 0 : i32
    return %arg0, %c0_i32 : i32, i32
  }
  func.func @transform_1(%arg0: i32) -> (i32, i32) {
    %c0_i32 = arith.constant 0 : i32
    %c0_i32_0 = arith.constant 0 : i32
    %c0_i32_1 = arith.constant 0 : i32
    return %c0_i32, %c0_i32_0 : i32, i32
  }
  func.func @transform_2(%arg0: i32) -> (i32, i32) {
    %c0_i32 = arith.constant 0 : i32
    %c0_i32_0 = arith.constant 0 : i32
    %c0_i32_1 = arith.constant 0 : i32
    return %c0_i32, %c0_i32_0 : i32, i32
  }
  func.func @transform_3(%arg0: i32) -> (i32, i32) {
    %c0_i32 = arith.constant 0 : i32
    %c0_i32_0 = arith.constant 0 : i32
    %c0_i32_1 = arith.constant 0 : i32
    return %c0_i32, %c0_i32_0 : i32, i32
  }
  func.func @transform_4(%arg0: i32) -> (i32, i32) {
    %c0_i32 = arith.constant 0 : i32
    %c0_i32_0 = arith.constant 0 : i32
    %c0_i32_1 = arith.constant 0 : i32
    return %c0_i32, %c0_i32_0 : i32, i32
  }
  func.func @transform_5(%arg0: i32) -> (i32, i32) {
    %c0_i32 = arith.constant 0 : i32
    %c0_i32_0 = arith.constant 0 : i32
    %c0_i32_1 = arith.constant 0 : i32
    return %c0_i32, %c0_i32_0 : i32, i32
  }
  func.func @transform_6(%arg0: i32) -> (i32, i32) {
    %c0_i32 = arith.constant 0 : i32
    %c0_i32_0 = arith.constant 0 : i32
    %c0_i32_1 = arith.constant 0 : i32
    return %c0_i32, %c0_i32_0 : i32, i32
  }
  func.func @transform_7(%arg0: i32) -> (i32, i32) {
    %c0_i32 = arith.constant 0 : i32
    %c0_i32_0 = arith.constant 0 : i32
    %c0_i32_1 = arith.constant 0 : i32
    return %c0_i32, %c0_i32_0 : i32, i32
  }
  func.func @transform_8(%arg0: i32) -> (i32, i32) {
    %c0_i32 = arith.constant 0 : i32
    %c0_i32_0 = arith.constant 0 : i32
    return %arg0, %c0_i32 : i32, i32
  }
}

</mosaic_0001>

<bundles_post_ra>
// kernel: neural_net_forward.1
= control target key start
LH: loop header
LB: loop body
LE: loop exit
PB: predicated region body
PF: predicated region fallthrough
CT: control target
= control target key end

     0   :  { %13 = vsyncpa [#allocation3], 0  ;;  %s1557_s0 = inlined_call_operand.vmem [shape: f32[32,128], index: 0, kind: input, shape index: {}]   ;;  %s1558_s1 = inlined_call_operand.vmem [shape: bf16[128,256], index: 1, kind: input, shape index: {}]   ;;  %s1559_s2 = inlined_call_operand.hbm [shape: f32[1,256], index: 2, kind: input, shape index: {}]   ;;  %s1560_s3 = inlined_call_operand.vmem [shape: bf16[256,256], index: 3, kind: input, shape index: {}]   ;;  %s1561_s4 = inlined_call_operand.hbm [shape: f32[1,256], index: 4, kind: input, shape index: {}]   ;;  %s1562_s5 = inlined_call_operand.vmem [shape: bf16[256,128], index: 5, kind: input, shape index: {}]   ;;  %s1563_s6 = inlined_call_operand.hbm [shape: f32[1,128], index: 6, kind: input, shape index: {}]   ;;  %s1564_s7 = inlined_call_operand.vmem [shape: bf16[128,128], index: 7, kind: input, shape index: {}]   ;;  %s1565_s8 = inlined_call_operand.vmem [shape: f32[32,128], index: 8, kind: output, shape index: {}]  }
   0x1   :  { %14 = vsyncpa [#allocation5], 0  ;;  %s1245_s27 = smov [#allocation4]   ;;  %s1246_s29 = smov [#allocation2]  }
   0x2   :  { %s37_s28 = sshll.u32 %s1245_s27, 4  ;;  %s25_s30 = sshll.u32 %s1246_s29, 4  ;;  %s38_s28 = int_to_ptr.vmem [resolvable:$true] %s37_s28  ;;  %s26_s30 = int_to_ptr.vmem [resolvable:$true] %s25_s30 }
   0x3   :  { %s1189_s9 = scalar_lea.vmem %s38_s28, 32  ;;  %p1194_p1 = scmp.lt.s32.totalorder %s38_s28, %s38_s28 }
   0x4   :  { %p1190_p0 = scmp.ne.s32.totalorder %s38_s28, %s1189_s9  ;;  %p1195_p2 = scmp.lt.s32.totalorder %s1189_s9, %s1189_s9 }
   0x6   :  { %p1196_p3 = por %p1195_p2, %p1194_p1 }
   0x8   :  { %p1197_p4 = pnand %p1196_p3, %p1190_p0 }
   0xa   :  { %1200 = shalt.err (!%p1197_p4)
}
   0xb   :  { %40 = dma.hbm_to_vmem [thread:$0]  %s1561_s4, 32, %s38_s28, [#allocation5]  }
   0xc   :  { %s1209_s12 = scalar_lea.vmem %s26_s30, 32  ;;  %p1214_p6 = scmp.lt.s32.totalorder %s26_s30, %s26_s30 }
   0xd   :  { %p1210_p5 = scmp.ne.s32.totalorder %s26_s30, %s1209_s12  ;;  %p1215_p7 = scmp.lt.s32.totalorder %s1209_s12, %s1209_s12 }
   0xf   :  { %p1216_p8 = por %p1215_p7, %p1214_p6 }
  0x11   :  { %p1217_p9 = pnand %p1216_p8, %p1210_p5 }
  0x13   :  { %1220 = shalt.err (!%p1217_p9)
}
  0x14   :  { %28 = dma.hbm_to_vmem [thread:$0]  %s1559_s2, 32, %s26_s30, [#allocation3]  }
  0x15   :  { %s1247_s15 = smov [#allocation6]  }
  0x16   :  { %s49_s16 = sshll.u32 %s1247_s15, 4  ;;  %s50_s16 = int_to_ptr.vmem [resolvable:$true] %s49_s16 }
  0x17   :  { %s1229_s17 = scalar_lea.vmem %s50_s16, 16  ;;  %s1233_s18 = scalar_lea.vmem %s50_s16, 32 }
  0x18   :  { %p1230_p10 = scmp.ne.s32.totalorder %s50_s16, %s1229_s17  ;;  %p1234_p11 = scmp.lt.s32.totalorder %s50_s16, %s50_s16 }
  0x19   :  { %p1235_p12 = scmp.lt.s32.totalorder %s1233_s18, %s1229_s17 }
  0x1b   :  { %p1236_p13 = por %p1235_p12, %p1234_p11 }
  0x1d   :  { %p1237_p0 = pnand %p1236_p13, %p1230_p10 }
  0x1f   :  { %1240 = shalt.err (!%p1237_p0)
}
  0x20   :  { %52 = dma.hbm_to_vmem [thread:$0]  %s1563_s6, 16, %s50_s16, [#allocation5]  }
  0x21   :  { %1241 = dma.done.wait [#allocation3], 32  }
  0x22   :  { %1242 = vsyncadd [#allocation3], 4294967264 }
  0x23   :  { %1243 = dma.done.wait [#allocation5], 48  }
  0x24   :  { %1244 = vsyncadd [#allocation5], 4294967248  ;;  %v1248_v0 = vmov 0   ;;  %v1037_v1 = vld [vmem:[%s1558_s1 + $0x74] ss:$8 sps:$4 sm:$0xff]   ;;  %v65_v26 = vld [vmem:[%s1557_s0] sm:$0xff]  ;;  %v89_v55 = vlaneseq }
  0x25   :  { %211 = vmatprep.mubr.bf16.mxu0 %v1248_v0  ;;  %v1039_v2 = vld [vmem:[%s1558_s1 + $0x70] ss:$8 sps:$4 sm:$0xff]   ;;  %179 = vmatprep.subr.bf16.mxu0 %v1037_v1  ;;  %v1040_v3 = vld [vmem:[%s1558_s1 + $0x64] ss:$8 sps:$4 sm:$0xff]   ;;  %v1042_v4 = vld [vmem:[%s1558_s1 + $0x60] ss:$8 sps:$4 sm:$0xff]  }
  0x26   :  { %180 = vmatpush1.bf16.msra.mxu0 %v1039_v2  ;;  %v1043_v5 = vld [vmem:[%s1558_s1 + $0x54] ss:$8 sps:$4 sm:$0xff]   ;;  %v1045_v6 = vld [vmem:[%s1558_s1 + $0x50] ss:$8 sps:$4 sm:$0xff]   ;;  %v1046_v7 = vld [vmem:[%s1558_s1 + $0x44] ss:$8 sps:$4 sm:$0xff]  }
  0x27   :  { %181 = vmatprep.subr.bf16.mxu0 %v1040_v3  ;;  %v1048_v8 = vld [vmem:[%s1558_s1 + $0x40] ss:$8 sps:$4 sm:$0xff]   ;;  %v1049_v9 = vld [vmem:[%s1558_s1 + $0x34] ss:$8 sps:$4 sm:$0xff]   ;;  %v1063_v11 = vld [vmem:[%s1560_s3 + $0x70] ss:$8 sps:$4 sm:$0xff]  }
  0x28   :  { %v1061_v10 = vld [vmem:[%s1560_s3 + $0x74] ss:$8 sps:$4 sm:$0xff]   ;;  %v1051_v12 = vld [vmem:[%s1558_s1 + $0x30] ss:$8 sps:$4 sm:$0xff]   ;;  %v1064_v13 = vld [vmem:[%s1560_s3 + $0x64] ss:$8 sps:$4 sm:$0xff]  }
  0x29   :  { %472 = vmatprep.subr.bf16.mxu1 %v1061_v10  ;;  %v1052_v14 = vld [vmem:[%s1558_s1 + $0x24] ss:$8 sps:$4 sm:$0xff]   ;;  %v1066_v15 = vld [vmem:[%s1560_s3 + $0x60] ss:$8 sps:$4 sm:$0xff]   ;;  %v1067_v16 = vld [vmem:[%s1560_s3 + $0x54] ss:$8 sps:$4 sm:$0xff]  }
  0x2a   :  { %182 = vmatpush1.bf16.msra.mxu0 %v1042_v4  ;;  %473 = vmatpush1.bf16.msra.mxu1 %v1063_v11  ;;  %v1054_v17 = vld [vmem:[%s1558_s1 + $0x20] ss:$8 sps:$4 sm:$0xff]   ;;  %v1055_v18 = vld [vmem:[%s1558_s1 + $0x14] ss:$8 sps:$4 sm:$0xff]   ;;  %v1069_v19 = vld [vmem:[%s1560_s3 + $0x50] ss:$8 sps:$4 sm:$0xff]  }
  0x2b   :  { %183 = vmatprep.subr.bf16.mxu0 %v1043_v5  ;;  %474 = vmatprep.subr.bf16.mxu1 %v1064_v13  ;;  %v1070_v20 = vld [vmem:[%s1560_s3 + $0x44] ss:$8 sps:$4 sm:$0xff]   ;;  %v1057_v21 = vld [vmem:[%s1558_s1 + $0x10] ss:$8 sps:$4 sm:$0xff]   ;;  %v1072_v23 = vld [vmem:[%s1560_s3 + $0x40] ss:$8 sps:$4 sm:$0xff]  }
  0x2c   :  { %v1058_v22 = vld [vmem:[%s1558_s1 + $0x4] ss:$8 sps:$4 sm:$0xff]   ;;  %v1073_v24 = vld [vmem:[%s1560_s3 + $0x34] ss:$8 sps:$4 sm:$0xff]   ;;  %v1060_v25 = vld [vmem:[%s1558_s1] ss:$8 sps:$4 sm:$0xff]  }
  0x2d   :  { %v66_v27 = vld [vmem:[%s1557_s0 + $0x8] sm:$0xff]  ;;  %v1075_v28 = vld [vmem:[%s1560_s3 + $0x30] ss:$8 sps:$4 sm:$0xff]   ;;  %v1079_v32 = vld [vmem:[%s1560_s3 + $0x14] ss:$8 sps:$4 sm:$0xff]   ;;  %v1461_v56 = vshrl.u32 %v89_v55, 7 }
  0x2e   :  { %184 = vmatpush1.bf16.msra.mxu0 %v1045_v6  ;;  %475 = vmatpush1.bf16.msra.mxu1 %v1066_v15  ;;  %v1076_v29 = vld [vmem:[%s1560_s3 + $0x24] ss:$8 sps:$4 sm:$0xff]   ;;  %v1078_v30 = vld [vmem:[%s1560_s3 + $0x20] ss:$8 sps:$4 sm:$0xff]   ;;  %v69_v31 = vpack.c.bf16 %v66_v27, %v65_v26  ;;  %v67_v33 = vld [vmem:[%s1557_s0 + $0x10] sm:$0xff] }
  0x2f   :  { %185 = vmatprep.subr.bf16.mxu0 %v1046_v7  ;;  %476 = vmatprep.subr.bf16.mxu1 %v1067_v16  ;;  %v68_v34 = vld [vmem:[%s1557_s0 + $0x18] sm:$0xff]  ;;  %v1082_v36 = vld [vmem:[%s1560_s3 + $0x4] ss:$8 sps:$4 sm:$0xff]   ;;  %v1084_v37 = vld [vmem:[%s1560_s3] ss:$8 sps:$4 sm:$0xff]   ;;  %v91_v57 = vsub.s32 0, %v1461_v56 }
  0x30   :  { %v1081_v35 = vld [vmem:[%s1560_s3 + $0x10] ss:$8 sps:$4 sm:$0xff]   ;;  %v70_v38 = vpack.c.bf16 %v68_v34, %v67_v33  ;;  %v1085_v39 = vld [vmem:[%s1560_s3 + $0xf4] ss:$8 sps:$4 sm:$0xff]   ;;  %v1088_v41 = vld [vmem:[%s1560_s3 + $0xe4] ss:$8 sps:$4 sm:$0xff]  }
  0x31   :  { %v1087_v40 = vld [vmem:[%s1560_s3 + $0xf0] ss:$8 sps:$4 sm:$0xff]   ;;  %v1090_v42 = vld [vmem:[%s1560_s3 + $0xe0] ss:$8 sps:$4 sm:$0xff]   ;;  %v1091_v43 = vld [vmem:[%s1560_s3 + $0xd4] ss:$8 sps:$4 sm:$0xff]  }
  0x32   :  { %186 = vmatpush1.bf16.msra.mxu0 %v1048_v8  ;;  %477 = vmatpush1.bf16.msra.mxu1 %v1069_v19  ;;  %v1093_v44 = vld [vmem:[%s1560_s3 + $0xd0] ss:$8 sps:$4 sm:$0xff]   ;;  %v1094_v45 = vld [vmem:[%s1560_s3 + $0xc4] ss:$8 sps:$4 sm:$0xff]   ;;  %v1096_v46 = vld [vmem:[%s1560_s3 + $0xc0] ss:$8 sps:$4 sm:$0xff]  }
  0x33   :  { %187 = vmatprep.subr.bf16.mxu0 %v1049_v9  ;;  %478 = vmatprep.subr.bf16.mxu1 %v1070_v20  ;;  %v1097_v47 = vld [vmem:[%s1560_s3 + $0xb4] ss:$8 sps:$4 sm:$0xff]   ;;  %v1099_v48 = vld [vmem:[%s1560_s3 + $0xb0] ss:$8 sps:$4 sm:$0xff]   ;;  %v1100_v49 = vld [vmem:[%s1560_s3 + $0xa4] ss:$8 sps:$4 sm:$0xff]  }
  0x34   :  { %v1102_v50 = vld [vmem:[%s1560_s3 + $0xa0] ss:$8 sps:$4 sm:$0xff]   ;;  %v1103_v51 = vld [vmem:[%s1560_s3 + $0x94] ss:$8 sps:$4 sm:$0xff]   ;;  %v1105_v52 = vld [vmem:[%s1560_s3 + $0x90] ss:$8 sps:$4 sm:$0xff]  }
  0x35   :  { %v1106_v53 = vld [vmem:[%s1560_s3 + $0x84] ss:$8 sps:$4 sm:$0xff]   ;;  %v1108_v54 = vld [vmem:[%s1560_s3 + $0x80] ss:$8 sps:$4 sm:$0xff]   ;;  %v95_v59 = vsub.s32 1, %v1461_v56 }
  0x36   :  { %188 = vmatpush1.bf16.msra.mxu0 %v1051_v12  ;;  %479 = vmatpush1.bf16.msra.mxu1 %v1072_v23  ;;  %v87_v58 = vld [vmem:[#allocation2] sm:$0x3]  ;;  %v1114_v55 = vld [vmem:[%s1562_s5 + $0x28] sm:$0xff]  }
  0x37   :  { %189 = vmatprep.subr.bf16.mxu0 %v1052_v14  ;;  %480 = vmatprep.subr.bf16.mxu1 %v1073_v24  ;;  %v92_v60 = vrot.slane %v87_v58, %v91_v57  ;;  %v96_v61 = vrot.slane %v87_v58, %v95_v59  ;;  %v1115_v58 = vld [vmem:[%s1562_s5 + $0x60] sm:$0xff]  }
  0x3a   :  { %190 = vmatpush1.bf16.msra.mxu0 %v1054_v17  ;;  %481 = vmatpush1.bf16.msra.mxu1 %v1075_v28 }
  0x3b   :  { %191 = vmatprep.subr.bf16.mxu0 %v1055_v18  ;;  %482 = vmatprep.subr.bf16.mxu1 %v1076_v29 }
  0x3e   :  { %192 = vmatpush1.bf16.msra.mxu0 %v1057_v21  ;;  %483 = vmatpush1.bf16.msra.mxu1 %v1078_v30 }
  0x3f   :  { %193 = vmatprep.subr.bf16.mxu0 %v1058_v22  ;;  %484 = vmatprep.subr.bf16.mxu1 %v1079_v32 }
  0x42   :  { %194 = vmatpush1.bf16.msra.mxu0 %v1060_v25  ;;  %485 = vmatpush1.bf16.msra.mxu1 %v1081_v35 }
  0x43   :  { %486 = vmatprep.subr.bf16.mxu1 %v1082_v36 }
  0x45   :  { %212 = vmatmul.mubr.bf16.vlgmr.msra.gmra.mxu0 %v69_v31 }
  0x46   :  { %221 = vmatprep.mubr.bf16.mxu0 %v1248_v0  ;;  %487 = vmatpush1.bf16.msra.mxu1 %v1084_v37 }
  0x47   :  { %488 = vmatprep.subr.bf16.mxu1 %v1085_v39 }
  0x4a   :  { %489 = vmatpush2.bf16.msra.mxu1 %v1087_v40 }
  0x4b   :  { %490 = vmatprep.subr.bf16.mxu1 %v1088_v41 }
  0x4d   :  { %222 = vmatmul.mubr.bf16.gmra.mxu0 %v70_v38 }
  0x4e   :  { %491 = vmatpush2.bf16.msra.mxu1 %v1090_v42 }
  0x4f   :  { %492 = vmatprep.subr.bf16.mxu1 %v1091_v43 }
  0x52   :  { %493 = vmatpush2.bf16.msra.mxu1 %v1093_v44 }
  0x53   :  { %494 = vmatprep.subr.bf16.mxu1 %v1094_v45 }
  0x56   :  { %495 = vmatpush2.bf16.msra.mxu1 %v1096_v46 }
  0x57   :  { %496 = vmatprep.subr.bf16.mxu1 %v1097_v47 }
  0x5a   :  { %497 = vmatpush2.bf16.msra.mxu1 %v1099_v48 }
  0x5b   :  { %498 = vmatprep.subr.bf16.mxu1 %v1100_v49 }
  0x5e   :  { %499 = vmatpush2.bf16.msra.mxu1 %v1102_v50  ;;  %v1109_v50 = vld [vmem:[%s1562_s5 + $0x78] sm:$0xff]  }
  0x5f   :  { %500 = vmatprep.subr.bf16.mxu1 %v1103_v51  ;;  %v1110_v51 = vld [vmem:[%s1562_s5 + $0x38] sm:$0xff]   ;;  %975 = vmatprep.subr.bf16.mxu0 %v1109_v50 }
  0x60   :  { %976 = vmatpush3.bf16.msra.mxu0 %v1110_v51 }
  0x62   :  { %501 = vmatpush2.bf16.msra.mxu1 %v1105_v52  ;;  %v1111_v52 = vld [vmem:[%s1562_s5 + $0x70] sm:$0xff]  }
  0x63   :  { %502 = vmatprep.subr.bf16.mxu1 %v1106_v53  ;;  %v1112_v53 = vld [vmem:[%s1562_s5 + $0x30] sm:$0xff]   ;;  %977 = vmatprep.subr.bf16.mxu0 %v1111_v52 }
  0x64   :  { %978 = vmatpush3.bf16.msra.mxu0 %v1112_v53 }
  0x66   :  { %503 = vmatpush2.bf16.msra.mxu1 %v1108_v54  ;;  %v1113_v54 = vld [vmem:[%s1562_s5 + $0x68] sm:$0xff]  }
  0x67   :  { %979 = vmatprep.subr.bf16.mxu0 %v1113_v54 }
  0x68   :  { %980 = vmatpush3.bf16.msra.mxu0 %v1114_v55 }
  0x69   :  { %981 = vmatprep.subr.bf16.mxu0 %v1115_v58 }
 0x105   :  { %v213_v62 = vpop.f32.mrf.mxu0 }
 0x106   :  { %v214_v63 = vadd.f32 %v213_v62, %v92_v60  ;;  %v1118_v62 = vld [vmem:[%s1562_s5 + $0x18] sm:$0xff]  }
 0x107   :  { %v215_v0 = vpop.f32.mrf.mxu0 }
 0x108   :  { %v216_v1 = vadd.f32 %v215_v0, %v96_v61  ;;  %v232_v2 = vmul.f32 0.5, %v214_v63  ;;  %v1119_v63 = vld [vmem:[%s1562_s5 + $0x50] sm:$0xff]  }
 0x109   :  { %v217_v3 = vpop.f32.mrf.mxu0  ;;  %v1120_v0 = vld [vmem:[%s1562_s5 + $0x10] sm:$0xff]  }
 0x10a   :  { %v233_v4 = vmul.f32 0.5, %v216_v1  ;;  %v218_v5 = vadd.f32 %v217_v3, %v92_v60  ;;  %v1121_v1 = vld [vmem:[%s1562_s5 + $0x48] sm:$0xff]   ;;  %v1123_v3 = vld [vmem:[%s1562_s5 + $0x40] sm:$0xff]  }
 0x10b   :  { %v219_v6 = vpop.f32.mrf.mxu0 }
 0x10c   :  { %1133 = vtanh.f32 %v233_v4  ;;  %v234_v7 = vmul.f32 0.5, %v218_v5  ;;  %v220_v8 = vadd.f32 %v219_v6, %v96_v61  ;;  %v1124_v4 = vld [vmem:[%s1562_s5] sm:$0xff]  }
 0x10d   :  { %1135 = vtanh.f32 %v232_v2  ;;  %v223_v9 = vpop.f32.mrf.mxu0  ;;  %v1122_v2 = vld [vmem:[%s1562_s5 + $0x8] sm:$0xff]   ;;  %v300_v5 = vld [vmem:[#allocation4] sm:$0x3] }
 0x10e   :  { %1137 = vtanh.f32 %v234_v7  ;;  %v235_v10 = vmul.f32 0.5, %v220_v8  ;;  %v224_v11 = vadd.f32 %v223_v9, %v92_v60  ;;  %v305_v6 = vrot.slane %v300_v5, %v91_v57 }
 0x10f   :  { %v225_v12 = vpop.f32.mrf.mxu0  ;;  %v309_v7 = vrot.slane %v300_v5, %v95_v59 }
 0x110   :  { %1139 = vtanh.f32 %v235_v10  ;;  %v226_v13 = vadd.f32 %v225_v12, %v96_v61  ;;  %v236_v14 = vmul.f32 0.5, %v224_v11 }
 0x111   :  { %v227_v15 = vpop.f32.mrf.mxu0 }
 0x112   :  { %v237_v16 = vmul.f32 0.5, %v226_v13  ;;  %v228_v17 = vadd.f32 %v227_v15, %v92_v60  ;;  %v1116_v60 = vld [vmem:[%s1562_s5 + $0x20] sm:$0xff]  }
 0x113   :  { %v229_v18 = vpop.f32.mrf.mxu0  ;;  %982 = vmatpush3.bf16.msra.mxu0 %v1116_v60 }
 0x114   :  { %1141 = vtanh.f32 %v237_v16  ;;  %v238_v19 = vmul.f32 0.5, %v228_v17  ;;  %v230_v20 = vadd.f32 %v229_v18, %v96_v61  ;;  %v1117_v61 = vld [vmem:[%s1562_s5 + $0x58] sm:$0xff]  }
 0x115   :  { %1143 = vtanh.f32 %v236_v14  ;;  %983 = vmatprep.subr.bf16.mxu0 %v1117_v61 }
 0x116   :  { %1145 = vtanh.f32 %v238_v19  ;;  %v239_v21 = vmul.f32 0.5, %v230_v20 }
 0x117   :  { %984 = vmatpush3.bf16.msra.mxu0 %v1118_v62  ;;  %v950_v62 = vld [vmem:[#allocation6] ss:$0 sm:$0xff] }
 0x118   :  { %1147 = vtanh.f32 %v239_v21  ;;  %985 = vmatprep.subr.bf16.mxu0 %v1119_v63 }
 0x119   :  { %v1134_v22 = vpop.eup %1133 }
 0x11a   :  { %v1136_v23 = vpop.eup %1135  ;;  %v249_v26 = vadd.f32 1.0, %v1134_v22 }
 0x11b   :  { %v1138_v24 = vpop.eup %1137  ;;  %v248_v28 = vadd.f32 1.0, %v1136_v23  ;;  %986 = vmatpush3.bf16.msra.mxu0 %v1120_v0 }
 0x11c   :  { %v250_v25 = vadd.f32 1.0, %v1138_v24  ;;  %v257_v31 = vmul.f32 0.5, %v249_v26  ;;  %987 = vmatprep.subr.bf16.mxu0 %v1121_v1 }
 0x11d   :  { %v1140_v27 = vpop.eup %1139  ;;  %v256_v34 = vmul.f32 0.5, %v248_v28 }
 0x11e   :  { %v251_v29 = vadd.f32 1.0, %v1140_v27  ;;  %v258_v30 = vmul.f32 0.5, %v250_v25 }
 0x11f   :  { %988 = vmatpush3.bf16.msra.mxu0 %v1122_v2 }
 0x120   :  { %v259_v32 = vmul.f32 0.5, %v251_v29  ;;  %v264_v38 = vpack.c.bf16 %v258_v30, %v256_v34  ;;  %989 = vmatprep.subr.bf16.mxu0 %v1123_v3 }
 0x121   :  { %v1142_v33 = vpop.eup %1141 }
 0x122   :  { %v1144_v35 = vpop.eup %1143  ;;  %v265_v36 = vpack.c.bf16 %v259_v32, %v257_v31  ;;  %v253_v39 = vadd.f32 1.0, %v1142_v33 }
 0x123   :  { %v1146_v37 = vpop.eup %1145  ;;  %v252_v42 = vadd.f32 1.0, %v1144_v35  ;;  %990 = vmatpush3.bf16.msra.mxu0 %v1124_v4 }
 0x124   :  { %v254_v40 = vadd.f32 1.0, %v1146_v37  ;;  %504 = vmatprep.mubr.bf16.mxu1 %v265_v36  ;;  %v261_v45 = vmul.f32 0.5, %v253_v39 }
 0x125   :  { %v1148_v41 = vpop.eup %1147  ;;  %505 = vmatmul.mubr.bf16.vlgmr.msra.gmra.mxu1 %v264_v38  ;;  %v260_v47 = vmul.f32 0.5, %v252_v42 }
 0x126   :  { %v255_v43 = vadd.f32 1.0, %v1148_v41  ;;  %v262_v44 = vmul.f32 0.5, %v254_v40 }
 0x128   :  { %v263_v46 = vmul.f32 0.5, %v255_v43  ;;  %v266_v49 = vpack.c.bf16 %v262_v44, %v260_v47 }
 0x12a   :  { %v267_v48 = vpack.c.bf16 %v263_v46, %v261_v45 }
 0x12c   :  { %514 = vmatprep.mubr.bf16.mxu1 %v267_v48 }
 0x12d   :  { %515 = vmatmul.mubr.bf16.gmra.mxu1 %v266_v49 }
 0x1e5   :  { %v506_v8 = vpop.f32.mrf.mxu1 }
 0x1e6   :  { %v507_v9 = vadd.f32 %v506_v8, %v305_v6 }
 0x1e7   :  { %v508_v10 = vpop.f32.mrf.mxu1 }
 0x1e8   :  { %v509_v11 = vadd.f32 %v508_v10, %v309_v7  ;;  %v525_v12 = vmul.f32 0.5, %v507_v9 }
 0x1e9   :  { %v510_v13 = vpop.f32.mrf.mxu1 }
 0x1ea   :  { %v526_v14 = vmul.f32 0.5, %v509_v11  ;;  %v511_v15 = vadd.f32 %v510_v13, %v305_v6 }
 0x1eb   :  { %v512_v16 = vpop.f32.mrf.mxu1 }
 0x1ec   :  { %1149 = vtanh.f32 %v526_v14  ;;  %v527_v17 = vmul.f32 0.5, %v511_v15  ;;  %v513_v18 = vadd.f32 %v512_v16, %v309_v7  ;;  %v1126_v14 = vld [vmem:[%s1564_s7 + $0x30] sm:$0xff]   ;;  %v1127_v15 = vld [vmem:[%s1564_s7 + $0x28] sm:$0xff]   ;;  %v1128_v16 = vld [vmem:[%s1564_s7 + $0x20] sm:$0xff]  }
 0x1ed   :  { %1151 = vtanh.f32 %v525_v12  ;;  %v516_v19 = vpop.f32.mrf.mxu1  ;;  %v1125_v12 = vld [vmem:[%s1564_s7 + $0x38] sm:$0xff]  }
 0x1ee   :  { %1153 = vtanh.f32 %v527_v17  ;;  %v528_v20 = vmul.f32 0.5, %v513_v18  ;;  %v517_v57 = vadd.f32 %v516_v19, %v305_v6  ;;  %1013 = vmatprep.subr.bf16.mxu0 %v1125_v12  ;;  %v1129_v17 = vld [vmem:[%s1564_s7 + $0x18] sm:$0xff]   ;;  %v1130_v18 = vld [vmem:[%s1564_s7 + $0x10] sm:$0xff]   ;;  %v1131_v19 = vld [vmem:[%s1564_s7 + $0x8] sm:$0xff]  }
 0x1ef   :  { %v518_v21 = vpop.f32.mrf.mxu1 }
 0x1f0   :  { %1155 = vtanh.f32 %v528_v20  ;;  %v519_v56 = vadd.f32 %v518_v21, %v309_v7  ;;  %v529_v59 = vmul.f32 0.5, %v517_v57  ;;  %v1132_v20 = vld [vmem:[%s1564_s7] sm:$0xff]  }
 0x1f1   :  { %v520_v22 = vpop.f32.mrf.mxu1 }
 0x1f2   :  { %v530_v23 = vmul.f32 0.5, %v519_v56  ;;  %v521_v24 = vadd.f32 %v520_v22, %v305_v6 }
 0x1f3   :  { %v522_v25 = vpop.f32.mrf.mxu1 }
 0x1f4   :  { %1157 = vtanh.f32 %v530_v23  ;;  %v531_v26 = vmul.f32 0.5, %v521_v24  ;;  %v523_v27 = vadd.f32 %v522_v25, %v309_v7 }
 0x1f5   :  { %1159 = vtanh.f32 %v529_v59 }
 0x1f6   :  { %1161 = vtanh.f32 %v531_v26  ;;  %v532_v28 = vmul.f32 0.5, %v523_v27 }
 0x1f8   :  { %1163 = vtanh.f32 %v532_v28 }
 0x1f9   :  { %v1150_v29 = vpop.eup %1149 }
 0x1fa   :  { %v1152_v30 = vpop.eup %1151  ;;  %v542_v32 = vadd.f32 1.0, %v1150_v29 }
 0x1fb   :  { %v1154_v31 = vpop.eup %1153  ;;  %v541_v35 = vadd.f32 1.0, %v1152_v30 }
 0x1fc   :  { %v543_v33 = vadd.f32 1.0, %v1154_v31  ;;  %v550_v38 = vmul.f32 0.5, %v542_v32 }
 0x1fd   :  { %v1156_v34 = vpop.eup %1155  ;;  %v549_v41 = vmul.f32 0.5, %v541_v35 }
 0x1fe   :  { %v544_v36 = vadd.f32 1.0, %v1156_v34  ;;  %v551_v37 = vmul.f32 0.5, %v543_v33 }
 0x200   :  { %v552_v39 = vmul.f32 0.5, %v544_v36  ;;  %v557_v45 = vpack.c.bf16 %v551_v37, %v549_v41 }
 0x201   :  { %v1158_v40 = vpop.eup %1157 }
 0x202   :  { %v1160_v42 = vpop.eup %1159  ;;  %v558_v43 = vpack.c.bf16 %v552_v39, %v550_v38  ;;  %v546_v46 = vadd.f32 1.0, %v1158_v40 }
 0x203   :  { %v1162_v44 = vpop.eup %1161  ;;  %v545_v49 = vadd.f32 1.0, %v1160_v42 }
 0x204   :  { %v547_v47 = vadd.f32 1.0, %v1162_v44  ;;  %728 = vmatprep.mubr.bf16.mxu0 %v558_v43  ;;  %v554_v52 = vmul.f32 0.5, %v546_v46 }
 0x205   :  { %v1164_v48 = vpop.eup %1163  ;;  %729 = vmatmul.mubr.bf16.vlgmr.msra.gmra.mxu0 %v557_v45  ;;  %v553_v54 = vmul.f32 0.5, %v545_v49 }
 0x206   :  { %v548_v50 = vadd.f32 1.0, %v1164_v48  ;;  %v555_v51 = vmul.f32 0.5, %v547_v47  ;;  %1014 = vmatpush3.bf16.msra.mxu0 %v1125_v12 }
 0x207   :  { %1015 = vmatprep.subr.bf16.mxu0 %v1126_v14 }
 0x208   :  { %v556_v53 = vmul.f32 0.5, %v548_v50  ;;  %v559_v58 = vpack.c.bf16 %v555_v51, %v553_v54 }
 0x20a   :  { %v560_v55 = vpack.c.bf16 %v556_v53, %v554_v52  ;;  %1016 = vmatpush3.bf16.msra.mxu0 %v1126_v14 }
 0x20b   :  { %1017 = vmatprep.subr.bf16.mxu0 %v1127_v15 }
 0x20c   :  { %736 = vmatprep.mubr.bf16.mxu0 %v560_v55 }
 0x20d   :  { %737 = vmatmul.mubr.bf16.gmra.mxu0 %v559_v58 }
 0x20e   :  { %1018 = vmatpush3.bf16.msra.mxu0 %v1127_v15 }
 0x20f   :  { %1019 = vmatprep.subr.bf16.mxu0 %v1128_v16 }
 0x212   :  { %1020 = vmatpush3.bf16.msra.mxu0 %v1128_v16 }
 0x213   :  { %1021 = vmatprep.subr.bf16.mxu0 %v1129_v17 }
 0x216   :  { %1022 = vmatpush3.bf16.msra.mxu0 %v1129_v17 }
 0x217   :  { %1023 = vmatprep.subr.bf16.mxu0 %v1130_v18 }
 0x21a   :  { %1024 = vmatpush3.bf16.msra.mxu0 %v1130_v18 }
 0x21b   :  { %1025 = vmatprep.subr.bf16.mxu0 %v1131_v19 }
 0x21e   :  { %1026 = vmatpush3.bf16.msra.mxu0 %v1131_v19 }
 0x21f   :  { %1027 = vmatprep.subr.bf16.mxu0 %v1132_v20 }
 0x222   :  { %1028 = vmatpush3.bf16.msra.mxu0 %v1132_v20 }
 0x2c5   :  { %v991_v60 = vpop.f32.mrf.mxu0 }
 0x2c7   :  { %v992_v61 = vpop.f32.mrf.mxu0 }
 0x2c8   :  { %v993_v63 = vadd.f32 %v992_v61, %v991_v60 }
 0x2c9   :  { %v994_v0 = vpop.f32.mrf.mxu0 }
 0x2ca   :  { %v731_v1 = vadd.f32 %v993_v63, %v950_v62 }
 0x2cb   :  { %v995_v2 = vpop.f32.mrf.mxu0 }
 0x2cc   :  { %v996_v3 = vadd.f32 %v995_v2, %v994_v0  ;;  %745 = vmax.xlane.f32.xlu0 %v731_v1 }
 0x2cd   :  { %v997_v4 = vpop.f32.mrf.mxu0 }
 0x2ce   :  { %v734_v5 = vadd.f32 %v996_v3, %v950_v62 }
 0x2cf   :  { %v998_v6 = vpop.f32.mrf.mxu0 }
 0x2d0   :  { %v999_v7 = vadd.f32 %v998_v6, %v997_v4  ;;  %747 = vmax.xlane.f32.xlu0 %v734_v5 }
 0x2d1   :  { %v1000_v8 = vpop.f32.mrf.mxu0 }
 0x2d2   :  { %v739_v9 = vadd.f32 %v999_v7, %v950_v62 }
 0x2d3   :  { %v1001_v10 = vpop.f32.mrf.mxu0 }
 0x2d4   :  { %v1002_v11 = vadd.f32 %v1001_v10, %v1000_v8  ;;  %749 = vmax.xlane.f32.xlu1 %v739_v9 }
 0x2d6   :  { %v742_v13 = vadd.f32 %v1002_v11, %v950_v62 }
 0x2d8   :  { %751 = vmax.xlane.f32.xlu1 %v742_v13 }
 0x355   :  { %v746_v57 = vpop.xlane.xlu0 %745 }
 0x356   :  { %v753_v21 = vsub.f32 %v731_v1, %v746_v57 }
 0x358   :  { %v757_v56 = vmul.f32 1.442695, %v753_v21 }
 0x359   :  { %v748_v59 = vpop.xlane.xlu0 %747 }
 0x35a   :  { %v754_v22 = vsub.f32 %v734_v5, %v748_v59  ;;  %1165 = vpow2.f32 %v757_v56 }
 0x35c   :  { %v759_v23 = vmul.f32 1.442695, %v754_v22 }
 0x35d   :  { %v750_v24 = vpop.xlane.xlu1 %749 }
 0x35e   :  { %1167 = vpow2.f32 %v759_v23  ;;  %v755_v25 = vsub.f32 %v739_v9, %v750_v24 }
 0x360   :  { %v761_v26 = vmul.f32 1.442695, %v755_v25 }
 0x361   :  { %v752_v27 = vpop.xlane.xlu1 %751 }
 0x362   :  { %v756_v28 = vsub.f32 %v742_v13, %v752_v27  ;;  %1169 = vpow2.f32 %v761_v26 }
 0x364   :  { %v763_v29 = vmul.f32 1.442695, %v756_v28 }
 0x366   :  { %1171 = vpow2.f32 %v763_v29 }
 0x367   :  { %v1166_v30 = vpop.eup %1165 }
 0x36b   :  { %v1168_v31 = vpop.eup %1167 }
 0x36c   :  { %v765_v32 = vpack.c.bf16 %v1168_v31, %v1166_v30 }
 0x36e   :  { %1029 = vmatprep.mubr.bf16.mxu0 %v765_v32  ;;  %v880_v42 = vunpack.c.l.bf16 %v765_v32  ;;  %v881_v48 = vunpack.c.h.bf16 %v765_v32 }
 0x36f   :  { %v1170_v33 = vpop.eup %1169 }
 0x373   :  { %v1172_v34 = vpop.eup %1171 }
 0x374   :  { %v766_v35 = vpack.c.bf16 %v1172_v34, %v1170_v33 }
 0x376   :  { %1030 = vmatmul.mubr.bf16.vlgmr.msra.gmra.mxu0 %v766_v35  ;;  %v882_v40 = vunpack.c.l.bf16 %v766_v35  ;;  %v883_v46 = vunpack.c.h.bf16 %v766_v35 }
 0x436   :  { %v1031_v36 = vpop.f32.mrf.mxu0 }
 0x437   :  { %1173 = vrcp.f32 %v1031_v36 }
 0x438   :  { %v865_v37 = vpop.f32.mrf.mxu0 }
 0x439   :  { %1175 = vrcp.f32 %v865_v37 }
 0x43a   :  { %v1032_v38 = vpop.f32.mrf.mxu0 }
 0x43b   :  { %1177 = vrcp.f32 %v1032_v38 }
 0x43c   :  { %v868_v39 = vpop.f32.mrf.mxu0 }
 0x43d   :  { %1179 = vrcp.f32 %v868_v39 }
 0x444   :  { %v1174_v41 = vpop.eup %1173 }
 0x445   :  { %v889_v43 = vmul.f32 %v1174_v41, %v882_v40 }
 0x446   :  { %v1176_v44 = vpop.eup %1175 }
 0x447   :  { %894 = vst [vmem:[%s1565_s8 + $0x10] sm:$0xff] %v889_v43  ;;  %v885_v45 = vmul.f32 %v1176_v44, %v880_v42 }
 0x448   :  { %v1178_v47 = vpop.eup %1177 }
 0x449   :  { %892 = vst [vmem:[%s1565_s8] sm:$0xff] %v885_v45  ;;  %v891_v49 = vmul.f32 %v1178_v47, %v883_v46 }
 0x44a   :  { %v1180_v50 = vpop.eup %1179 }
 0x44b   :  { %895 = vst [vmem:[%s1565_s8 + $0x18] sm:$0xff] %v891_v49  ;;  %v887_v51 = vmul.f32 %v1180_v50, %v881_v48 }
 0x44d   :  { %893 = vst [vmem:[%s1565_s8 + $0x8] sm:$0xff] %v887_v51 }
 0x44e   :  { %900 = vsyncpa [#allocation3], 1 }
 0x44f   :  { %901 = vsyncpa [#allocation5], 1 }

</bundles_post_ra>
